<compile_context>
chip_gen: v7x
topology: tpu7x:2x2x1
jax: 0.10.0
libtpu: 0.0.40
codegen_flags: <defaults>
</compile_context>

<pallas_src>
import jax
import jax.numpy as jnp
from jax import lax
from jax.experimental import pallas as pl
from jax.experimental.pallas import tpu as pltpu


# --------------------------------------------------------------------------
# Kernel
# --------------------------------------------------------------------------
def ick_kernel(x1_ref, x2_ref, w11_ref, b11_ref, w21_ref, b21_ref,
               w12t_ref, w22t_ref, out_ref):
    mm = w11_ref.dtype  # MXU operand dtype (bf16 by default)

    # Layer 1 per modality: canonical MXU matmul, f32 accumulation, f32 bias
    # add (sublane broadcast) + ReLU on the VPU. The augmented hidden unit
    # (zero weight column + bias 1) comes out of the ReLU as exactly 1.
    h1 = jnp.dot(x1_ref[...].astype(mm), w11_ref[...],
                 preferred_element_type=jnp.float32)
    h1 = jnp.maximum(h1 + b11_ref[...], 0.0)
    h2 = jnp.dot(x2_ref[...].astype(mm), w21_ref[...],
                 preferred_element_type=jnp.float32)
    h2 = jnp.maximum(h2 + b21_ref[...], 0.0)

    # Layer 2 in the transposed orientation:
    #   z?T[l, b] = sum_h W?2[h, l] * h?[b, h]  (+ bias via the always-one unit)
    # so batch lands on the lane axis of the (L, batch_block) result.
    dn = (((1,), (1,)), ((), ()))
    z1t = lax.dot_general(w12t_ref[...], h1.astype(mm), dn,
                          preferred_element_type=jnp.float32)
    z2t = lax.dot_general(w22t_ref[...], h2.astype(mm), dn,
                          preferred_element_type=jnp.float32)

    # ICK inner product: full-lane-width product, sublane reduction. The
    # result is already the lane-dense (1, batch_block) output row.
    out_ref[...] = jnp.sum(z1t * z2t, axis=0, keepdims=True)


# --------------------------------------------------------------------------
# Host-side helpers
# --------------------------------------------------------------------------
def _vmem_capacity_bytes(default=64 << 20):
    """Physical VMEM per core; conservative (v7x-sized) default on failure."""
    try:
        info = pltpu.get_tpu_info()
        cap = getattr(info, "vmem_capacity_bytes", None)
        if cap:
            return int(cap)
    except Exception:
        pass
    return default


def _tile_vmem_bytes(bb, d1, d2, ha, latent, matmul_dtype):
    """Per-step VMEM need for batch tile `bb` (double-buffered I/O tiles)."""
    w_elem = jnp.dtype(matmul_dtype).itemsize
    x_tiles = 2 * bb * (d1 + d2) * 4                    # f32 inputs, 2 buffers
    out_tiles = 2 * bb * 4                              # f32 (1, bb) rows, 2 buffers
    weights = (d1 + d2 + 2 * latent) * ha * w_elem + 2 * ha * 4
    interm = bb * (2 * ha + 2 * latent) * 4             # h1, h2, z1t, z2t temporaries
    return x_tiles + out_tiles + 2 * weights + interm


def _pick_batch_block(batch, d1, d2, ha, latent, matmul_dtype, vmem_budget):
    """Largest lane-aligned tile that fits the VMEM budget, preferring >= 4
    grid steps (>= 2 per TensorCore on 2-core parts), then >= 2 steps."""
    for min_steps in (4, 2):
        for cand in (2048, 1024, 512, 256, 128):
            if (batch % cand == 0 and batch // cand >= min_steps and
                    _tile_vmem_bytes(cand, d1, d2, ha, latent, matmul_dtype)
                    <= vmem_budget):
                return cand
    return batch  # small batch: single full tile (still lane-dense output)


def pack_ick_params(params, matmul_dtype):
    """Pack per-modality weights:
      * layer 1 gets one extra hidden unit (zero weights, bias 1) that is
        always 1 after ReLU and carries the layer-2 bias through the MXU;
      * layer 2 is stored transposed, (latent, hidden+1), with the bias as
        the last column (multiplying the always-one unit)."""
    (w11, b11, w12, b12, w21, b21, w22, b22) = params
    latent = w12.shape[1]
    ha = w11.shape[1] + 1

    def layer1(w, b):
        wa = jnp.concatenate([w, jnp.zeros((w.shape[0], 1), w.dtype)], axis=1)
        ba = jnp.concatenate([b, jnp.ones((1, 1), b.dtype)], axis=1)
        return wa.astype(matmul_dtype), ba.astype(jnp.float32)

    def layer2_t(w, b):
        return jnp.concatenate([w.T, b.reshape(-1, 1)], axis=1).astype(matmul_dtype)

    w11a, b11a = layer1(w11, b11)
    w21a, b21a = layer1(w21, b21)
    w12at = layer2_t(w12, b12)
    w22at = layer2_t(w22, b22)
    return (w11a, b11a, w21a, b21a, w12at, w22at), latent, ha


def ick_forward(x1, x2, params, *, batch_block=None, matmul_dtype=jnp.bfloat16):
    """Fused ICK forward. Returns shape (batch,) float32.

    Note: with the default matmul_dtype=bf16, MXU operands are bf16-rounded
    (f32 accumulation). Pass matmul_dtype=jnp.float32 for full f32 parity
    with the PyTorch module.
    """
    B, d1 = x1.shape
    assert x2.shape[0] == B
    d2 = x2.shape[1]

    (w11a, b11a, w21a, b21a, w12at, w22at), latent, ha = \
        pack_ick_params(params, matmul_dtype)

    # Inputs streamed as f32 (cast inside the kernel) — no wrapper HBM pass.
    x1 = x1.astype(jnp.float32)
    x2 = x2.astype(jnp.float32)

    vmem_cap = _vmem_capacity_bytes()
    if batch_block is None:
        batch_block = _pick_batch_block(B, d1, d2, ha, latent, matmul_dtype,
                                        vmem_cap // 2)
    assert B % batch_block == 0
    # Lane-dense output block requires full-batch or 128-aligned tiles.
    assert batch_block == B or batch_block % 128 == 0
    num_blocks = B // batch_block

    # Tight VMEM request: actual per-step need + small headroom, capped well
    # below the physical capacity (matters on v7x's 64 MiB VMEM).
    need = _tile_vmem_bytes(batch_block, d1, d2, ha, latent, matmul_dtype)
    vmem_limit = int(min(max(need + (4 << 20), 16 << 20), (vmem_cap * 3) // 4))

    # Advisory cost estimate.
    w_elem = jnp.dtype(matmul_dtype).itemsize
    flops = 2 * B * ((d1 + d2) * ha + 2 * ha * latent) + 2 * B * latent
    bytes_accessed = (B * (d1 + d2) * 4
                      + (d1 + d2 + 2 * latent) * ha * w_elem
                      + 2 * ha * 4 + B * 4)
    cost = pl.CostEstimate(flops=flops, transcendentals=0,
                           bytes_accessed=bytes_accessed)

    out = pl.pallas_call(
        ick_kernel,
        out_shape=jax.ShapeDtypeStruct((1, B), jnp.float32),
        grid_spec=pltpu.PrefetchScalarGridSpec(
            num_scalar_prefetch=0,
            grid=(num_blocks,),
            in_specs=[
                # Streamed, batch-tiled f32 inputs.
                # TODO(synk): if a profile shows exposed x DMA at very small
                # feature dims, add pipeline_mode=pl.Buffered(3) here.
                pl.BlockSpec((batch_block, d1), lambda i: (i, 0)),
                pl.BlockSpec((batch_block, d2), lambda i: (i, 0)),
                # Resident weights / biases (constant index maps).
                pl.BlockSpec((d1, ha), lambda i: (0, 0)),      # W11 (augmented)
                pl.BlockSpec((1, ha), lambda i: (0, 0)),       # b11 (augmented, f32)
                pl.BlockSpec((d2, ha), lambda i: (0, 0)),      # W21 (augmented)
                pl.BlockSpec((1, ha), lambda i: (0, 0)),       # b21 (augmented, f32)
                pl.BlockSpec((latent, ha), lambda i: (0, 0)),  # W12ᵀ (bias folded)
                pl.BlockSpec((latent, ha), lambda i: (0, 0)),  # W22ᵀ (bias folded)
            ],
            out_specs=pl.BlockSpec((1, batch_block), lambda i: (0, i)),
        ),
        compiler_params=pltpu.CompilerParams(
            dimension_semantics=("parallel",),
            vmem_limit_bytes=vmem_limit,
        ),
        cost_estimate=cost,
    )(x1, x2, w11a, b11a, w21a, b21a, w12at, w22at)

    return out[0]


# --------------------------------------------------------------------------
# Parameter init + references
# --------------------------------------------------------------------------
def make_params(key, d1, d2, hidden, latent):
    """Deterministic (PRNGKey-seeded) parameter init, Kaiming-uniform-ish."""
    ks = jax.random.split(key, 8)

    def lin(k, fan_in, fan_out):
        bound = 1.0 / jnp.sqrt(fan_in)
        return jax.random.uniform(k, (fan_in, fan_out), jnp.float32, -bound, bound)

    w11 = lin(ks[0], d1, hidden)
    b11 = lin(ks[1], 1, hidden) * 0.1
    w12 = lin(ks[2], hidden, latent)
    b12 = lin(ks[3], 1, latent) * 0.1
    w21 = lin(ks[4], d2, hidden)
    b21 = lin(ks[5], 1, hidden) * 0.1
    w22 = lin(ks[6], hidden, latent)
    b22 = lin(ks[7], 1, latent) * 0.1
    return (w11, b11, w12, b12, w21, b21, w22, b22)


def ick_reference(x1, x2, params):
    """Plain-JAX f32 reference of the ICK forward (module semantics)."""
    (w11, b11, w12, b12, w21, b21, w22, b22) = params
    z1 = jnp.maximum(x1 @ w11 + b11, 0.0) @ w12 + b12
    z2 = jnp.maximum(x2 @ w21 + b21, 0.0) @ w22 + b22
    latent = jnp.stack([z1, z2], axis=0)          # (num_modalities, B, L)
    return jnp.sum(jnp.prod(latent, axis=0), axis=1)


def ick_reference_matched(x1, x2, params, matmul_dtype=jnp.bfloat16):
    """Reference mirroring the kernel's bf16-operand / f32-accumulate recipe."""
    (w11, b11, w12, b12, w21, b21, w22, b22) = params
    d = matmul_dtype
    h1 = jnp.maximum(
        jnp.dot(x1.astype(d), w11.astype(d), preferred_element_type=jnp.float32)
        + b11, 0.0)
    h2 = jnp.maximum(
        jnp.dot(x2.astype(d), w21.astype(d), preferred_element_type=jnp.float32)
        + b21, 0.0)
    z1 = jnp.dot(h1.astype(d), w12.astype(d),
                 preferred_element_type=jnp.float32) + b12.astype(d).astype(jnp.float32)
    z2 = jnp.dot(h2.astype(d), w22.astype(d),
                 preferred_element_type=jnp.float32) + b22.astype(d).astype(jnp.float32)
    return jnp.sum(z1 * z2, axis=1)


# --------------------------------------------------------------------------
if __name__ == "__main__":
    key = jax.random.PRNGKey(0)
    k_x1, k_x2, k_p = jax.random.split(key, 3)

    B, D1, D2, H, L = 8, 32, 16, 64, 32

    x1 = jax.random.normal(k_x1, (B, D1), jnp.float32)
    x2 = jax.random.normal(k_x2, (B, D2), jnp.float32)
    params = make_params(k_p, D1, D2, H, L)

    out = jax.block_until_ready(ick_forward(x1, x2, params))
    assert out.shape == (B,)

    # Tight check against a reference using the same bf16-operand recipe.
    ref_matched = ick_reference_matched(x1, x2, params)
    assert jnp.allclose(out, ref_matched, atol=2e-3, rtol=2e-3), (out, ref_matched)

    # Loose check against the full-f32 module semantics (bf16 operand rounding).
    ref_f32 = ick_reference(x1, x2, params)
    assert jnp.allclose(out, ref_f32, atol=2e-1, rtol=1e-1), (out, ref_f32)

    print("KERNEL_OK")
</pallas_src>

<mosaic_0001>
module attributes {stable_mosaic.version = 11 : i64} {
  func.func @ick_kernel(%arg0: i32, %arg1: memref<8x32xf32, #tpu.memory_space<vmem>>, %arg2: memref<8x16xf32, #tpu.memory_space<vmem>>, %arg3: memref<32x65xbf16, #tpu.memory_space<vmem>>, %arg4: memref<1x65xf32, #tpu.memory_space<vmem>>, %arg5: memref<16x65xbf16, #tpu.memory_space<vmem>>, %arg6: memref<1x65xf32, #tpu.memory_space<vmem>>, %arg7: memref<32x65xbf16, #tpu.memory_space<vmem>>, %arg8: memref<32x65xbf16, #tpu.memory_space<vmem>>, %arg9: memref<1x8xf32, #tpu.memory_space<vmem>>) attributes {dimension_semantics = [#tpu.dimension_semantics<parallel>], iteration_bounds = array<i64: 1>, scalar_prefetch = 0 : i64, scratch_operands = 0 : i64, tpu.core_type = #tpu.core_type<tc>, window_params = [{transform_indices = @transform_0, window_bounds = array<i64: 8, 32>}, {transform_indices = @transform_1, window_bounds = array<i64: 8, 16>}, {pipeline_mode = #tpu.pipeline_mode<synchronous>, transform_indices = @transform_2, window_bounds = array<i64: 32, 65>}, {pipeline_mode = #tpu.pipeline_mode<synchronous>, transform_indices = @transform_3, window_bounds = array<i64: 1, 65>}, {pipeline_mode = #tpu.pipeline_mode<synchronous>, transform_indices = @transform_4, window_bounds = array<i64: 16, 65>}, {pipeline_mode = #tpu.pipeline_mode<synchronous>, transform_indices = @transform_5, window_bounds = array<i64: 1, 65>}, {pipeline_mode = #tpu.pipeline_mode<synchronous>, transform_indices = @transform_6, window_bounds = array<i64: 32, 65>}, {pipeline_mode = #tpu.pipeline_mode<synchronous>, transform_indices = @transform_7, window_bounds = array<i64: 32, 65>}, {transform_indices = @transform_8, window_bounds = array<i64: 1, 8>}]} {
    %c0 = arith.constant 0 : index
    %c0_0 = arith.constant 0 : index
    %0 = vector.load %arg1[%c0, %c0_0] : memref<8x32xf32, #tpu.memory_space<vmem>>, vector<8x32xf32>
    %1 = arith.truncf %0 : vector<8x32xf32> to vector<8x32xbf16>
    %c0_1 = arith.constant 0 : index
    %c0_2 = arith.constant 0 : index
    %2 = vector.load %arg3[%c0_1, %c0_2] : memref<32x65xbf16, #tpu.memory_space<vmem>>, vector<32x65xbf16>
    %cst = arith.constant dense<0.000000e+00> : vector<8x65xf32>
    %3 = tpu.matmul %1, %2, %cst {dimension_numbers = #tpu.dot_dimension_numbers<[1], [0], [0], [1], [0, 0, 1, 1], [], []>} : vector<8x32xbf16>, vector<32x65xbf16>, vector<8x65xf32> -> vector<8x65xf32>
    %c0_3 = arith.constant 0 : index
    %c0_4 = arith.constant 0 : index
    %4 = vector.load %arg4[%c0_3, %c0_4] : memref<1x65xf32, #tpu.memory_space<vmem>>, vector<1x65xf32>
    %5 = vector.broadcast %4 : vector<1x65xf32> to vector<8x65xf32>
    %6 = arith.addf %3, %5 : vector<8x65xf32>
    %cst_5 = arith.constant 0.000000e+00 : f32
    %7 = vector.broadcast %cst_5 : f32 to vector<8x65xf32>
    %8 = arith.maximumf %6, %7 : vector<8x65xf32>
    %c0_6 = arith.constant 0 : index
    %c0_7 = arith.constant 0 : index
    %9 = vector.load %arg2[%c0_6, %c0_7] : memref<8x16xf32, #tpu.memory_space<vmem>>, vector<8x16xf32>
    %10 = arith.truncf %9 : vector<8x16xf32> to vector<8x16xbf16>
    %c0_8 = arith.constant 0 : index
    %c0_9 = arith.constant 0 : index
    %11 = vector.load %arg5[%c0_8, %c0_9] : memref<16x65xbf16, #tpu.memory_space<vmem>>, vector<16x65xbf16>
    %cst_10 = arith.constant dense<0.000000e+00> : vector<8x65xf32>
    %12 = tpu.matmul %10, %11, %cst_10 {dimension_numbers = #tpu.dot_dimension_numbers<[1], [0], [0], [1], [0, 0, 1, 1], [], []>} : vector<8x16xbf16>, vector<16x65xbf16>, vector<8x65xf32> -> vector<8x65xf32>
    %c0_11 = arith.constant 0 : index
    %c0_12 = arith.constant 0 : index
    %13 = vector.load %arg6[%c0_11, %c0_12] : memref<1x65xf32, #tpu.memory_space<vmem>>, vector<1x65xf32>
    %14 = vector.broadcast %13 : vector<1x65xf32> to vector<8x65xf32>
    %15 = arith.addf %12, %14 : vector<8x65xf32>
    %cst_13 = arith.constant 0.000000e+00 : f32
    %16 = vector.broadcast %cst_13 : f32 to vector<8x65xf32>
    %17 = arith.maximumf %15, %16 : vector<8x65xf32>
    %c0_14 = arith.constant 0 : index
    %c0_15 = arith.constant 0 : index
    %18 = vector.load %arg7[%c0_14, %c0_15] : memref<32x65xbf16, #tpu.memory_space<vmem>>, vector<32x65xbf16>
    %19 = arith.truncf %8 : vector<8x65xf32> to vector<8x65xbf16>
    %cst_16 = arith.constant dense<0.000000e+00> : vector<32x8xf32>
    %20 = tpu.matmul %18, %19, %cst_16 {dimension_numbers = #tpu.dot_dimension_numbers<[1], [1], [0], [0], [0, 0, 1, 0], [], []>} : vector<32x65xbf16>, vector<8x65xbf16>, vector<32x8xf32> -> vector<32x8xf32>
    %c0_17 = arith.constant 0 : index
    %c0_18 = arith.constant 0 : index
    %21 = vector.load %arg8[%c0_17, %c0_18] : memref<32x65xbf16, #tpu.memory_space<vmem>>, vector<32x65xbf16>
    %22 = arith.truncf %17 : vector<8x65xf32> to vector<8x65xbf16>
    %cst_19 = arith.constant dense<0.000000e+00> : vector<32x8xf32>
    %23 = tpu.matmul %21, %22, %cst_19 {dimension_numbers = #tpu.dot_dimension_numbers<[1], [1], [0], [0], [0, 0, 1, 0], [], []>} : vector<32x65xbf16>, vector<8x65xbf16>, vector<32x8xf32> -> vector<32x8xf32>
    %24 = arith.mulf %20, %23 : vector<32x8xf32>
    %cst_20 = arith.constant dense<0.000000e+00> : vector<8xf32>
    %25 = vector.multi_reduction <add>, %24, %cst_20 [0] : vector<32x8xf32> to vector<8xf32>
    %26 = vector.shape_cast %25 : vector<8xf32> to vector<1x8xf32>
    %c0_21 = arith.constant 0 : index
    %c0_22 = arith.constant 0 : index
    %27 = vector.load %arg9[%c0_21, %c0_22] : memref<1x8xf32, #tpu.memory_space<vmem>>, vector<1x8xf32>
    tpu.vector_store %arg9[%c0_21, %c0_22], %26 {strides = array<i32>} : memref<1x8xf32, #tpu.memory_space<vmem>>, vector<1x8xf32>,
    return
  }
  func.func @transform_0(%arg0: i32) -> (i32, i32) {
    %c0_i32 = arith.constant 0 : i32
    %c0_i32_0 = arith.constant 0 : i32
    return %arg0, %c0_i32 : i32, i32
  }
  func.func @transform_1(%arg0: i32) -> (i32, i32) {
    %c0_i32 = arith.constant 0 : i32
    %c0_i32_0 = arith.constant 0 : i32
    return %arg0, %c0_i32 : i32, i32
  }
  func.func @transform_2(%arg0: i32) -> (i32, i32) {
    %c0_i32 = arith.constant 0 : i32
    %c0_i32_0 = arith.constant 0 : i32
    %c0_i32_1 = arith.constant 0 : i32
    return %c0_i32, %c0_i32_0 : i32, i32
  }
  func.func @transform_3(%arg0: i32) -> (i32, i32) {
    %c0_i32 = arith.constant 0 : i32
    %c0_i32_0 = arith.constant 0 : i32
    %c0_i32_1 = arith.constant 0 : i32
    return %c0_i32, %c0_i32_0 : i32, i32
  }
  func.func @transform_4(%arg0: i32) -> (i32, i32) {
    %c0_i32 = arith.constant 0 : i32
    %c0_i32_0 = arith.constant 0 : i32
    %c0_i32_1 = arith.constant 0 : i32
    return %c0_i32, %c0_i32_0 : i32, i32
  }
  func.func @transform_5(%arg0: i32) -> (i32, i32) {
    %c0_i32 = arith.constant 0 : i32
    %c0_i32_0 = arith.constant 0 : i32
    %c0_i32_1 = arith.constant 0 : i32
    return %c0_i32, %c0_i32_0 : i32, i32
  }
  func.func @transform_6(%arg0: i32) -> (i32, i32) {
    %c0_i32 = arith.constant 0 : i32
    %c0_i32_0 = arith.constant 0 : i32
    %c0_i32_1 = arith.constant 0 : i32
    return %c0_i32, %c0_i32_0 : i32, i32
  }
  func.func @transform_7(%arg0: i32) -> (i32, i32) {
    %c0_i32 = arith.constant 0 : i32
    %c0_i32_0 = arith.constant 0 : i32
    %c0_i32_1 = arith.constant 0 : i32
    return %c0_i32, %c0_i32_0 : i32, i32
  }
  func.func @transform_8(%arg0: i32) -> (i32, i32) {
    %c0_i32 = arith.constant 0 : i32
    %c0_i32_0 = arith.constant 0 : i32
    return %c0_i32, %arg0 : i32, i32
  }
}

</mosaic_0001>

<bundles_post_ra>
// kernel: tpu_custom_call.1
= control target key start
LH: loop header
LB: loop body
LE: loop exit
PB: predicated region body
PF: predicated region fallthrough
CT: control target
= control target key end

     0   :  { %13 = vsyncpa [#allocation3], 0  ;;  %s778_s0 = inlined_call_operand.hbm [shape: f32[8,32], index: 0, kind: input, shape index: {}]   ;;  %s779_s1 = inlined_call_operand.hbm [shape: f32[8,16], index: 1, kind: input, shape index: {}]   ;;  %s780_s2 = inlined_call_operand.hbm [shape: bf16[32,65], index: 2, kind: input, shape index: {}]   ;;  %s781_s3 = inlined_call_operand.vmem [shape: f32[1,65], index: 3, kind: input, shape index: {}]   ;;  %s782_s4 = inlined_call_operand.hbm [shape: bf16[16,65], index: 4, kind: input, shape index: {}]   ;;  %s783_s5 = inlined_call_operand.vmem [shape: f32[1,65], index: 5, kind: input, shape index: {}]   ;;  %s784_s6 = inlined_call_operand.vmem [shape: bf16[32,65], index: 6, kind: input, shape index: {}]   ;;  %s785_s7 = inlined_call_operand.hbm [shape: bf16[32,65], index: 7, kind: input, shape index: {}]   ;;  %s786_s8 = inlined_call_operand.hbm [shape: f32[1,8], index: 8, kind: output, shape index: {}]  }
   0x1   :  { %14 = vsyncpa [#allocation6], 0 }
   0x2   :  { %15 = vsyncpa [#allocation9], 0 }
   0x3   :  { %16 = vsyncpa [#allocation4], 0  ;;  %s622_s27 = smov [#allocation5]   ;;  %s482_s9 = scalar_lea.hbm %s779_s1, 128 }
   0x4   :  { %s33_s28 = sshll.u32 %s622_s27, 4  ;;  %p483_p0 = scmp.ne.s32.totalorder %s779_s1, %s482_s9  ;;  %s34_s28 = int_to_ptr.vmem [resolvable:$true] %s33_s28 }
   0x5   :  { %p486_p1 = scmp.lt.u32.totalorder %s482_s9, %s779_s1 }
   0x7   :  { %p488_p2 = pnand %p486_p1, %p483_p0 }
   0x9   :  { %491 = shalt.err (!%p488_p2)
}
   0xa   :  { %s492_s14 = scalar_lea.vmem %s34_s28, 128  ;;  %p497_p4 = scmp.lt.s32.totalorder %s34_s28, %s34_s28 }
   0xb   :  { %p493_p3 = scmp.ne.s32.totalorder %s34_s28, %s492_s14  ;;  %p498_p5 = scmp.lt.s32.totalorder %s492_s14, %s492_s14 }
   0xd   :  { %p499_p6 = por %p498_p5, %p497_p4 }
   0xf   :  { %p500_p7 = pnand %p499_p6, %p493_p3 }
  0x11   :  { %503 = shalt.err (!%p500_p7)
}
  0x12   :  { %36 = dma.hbm_to_vmem [thread:$0]  %s779_s1, 128, %s34_s28, [#allocation6]  }
  0x13   :  { %s623_s17 = smov [#allocation8]   ;;  %s624_s19 = smov [#allocation2]  }
  0x14   :  { %s56_s18 = sshll.u32 %s623_s17, 4  ;;  %s23_s20 = sshll.u32 %s624_s19, 4  ;;  %s57_s18 = int_to_ptr.vmem [resolvable:$true] %s56_s18  ;;  %s24_s20 = int_to_ptr.vmem [resolvable:$true] %s23_s20 }
  0x15   :  { %s504_s23 = scalar_lea.hbm %s782_s4, 128 }
  0x16   :  { %p505_p8 = scmp.ne.s32.totalorder %s782_s4, %s504_s23  ;;  %p508_p9 = scmp.lt.u32.totalorder %s504_s23, %s782_s4 }
  0x18   :  { %p510_p10 = pnand %p508_p9, %p505_p8 }
  0x1a   :  { %513 = shalt.err (!%p510_p10)
}
  0x1b   :  { %s514_s1 = scalar_lea.vmem %s57_s18, 128  ;;  %p519_p12 = scmp.lt.s32.totalorder %s57_s18, %s57_s18 }
  0x1c   :  { %p515_p11 = scmp.ne.s32.totalorder %s57_s18, %s514_s1  ;;  %p520_p13 = scmp.lt.s32.totalorder %s514_s1, %s514_s1 }
  0x1e   :  { %p521_p0 = por %p520_p13, %p519_p12 }
  0x20   :  { %p522_p1 = pnand %p521_p0, %p515_p11 }
  0x22   :  { %525 = shalt.err (!%p522_p1)
}
  0x23   :  { %s625_s28 = smov 64   ;;  %s626_s29 = smov 4  }
  0x24   :  { %62 = dma.hbm_to_vmem [thread:$0]  %s782_s4, 128, %s57_s18, [#allocation9], %s625_s28, %s625_s28, %s626_s29  }
  0x25   :  { %s526_s12 = scalar_lea.hbm %s778_s0, 128 }
  0x26   :  { %p527_p2 = scmp.ne.s32.totalorder %s778_s0, %s526_s12  ;;  %p530_p3 = scmp.lt.u32.totalorder %s526_s12, %s778_s0 }
  0x28   :  { %p532_p4 = pnand %p530_p3, %p527_p2 }
  0x2a   :  { %535 = shalt.err (!%p532_p4)
}
  0x2b   :  { %s536_s17 = scalar_lea.vmem %s24_s20, 128  ;;  %p541_p6 = scmp.lt.s32.totalorder %s24_s20, %s24_s20 }
  0x2c   :  { %p537_p5 = scmp.ne.s32.totalorder %s24_s20, %s536_s17  ;;  %p542_p7 = scmp.lt.s32.totalorder %s536_s17, %s536_s17 }
  0x2e   :  { %p543_p8 = por %p542_p7, %p541_p6 }
  0x30   :  { %p544_p9 = pnand %p543_p8, %p537_p5 }
  0x32   :  { %547 = shalt.err (!%p544_p9)
}
  0x33   :  { %26 = dma.hbm_to_vmem [thread:$0]  %s778_s0, 128, %s24_s20, [#allocation3]  }
  0x34   :  { %s627_s19 = smov [#allocation7]   ;;  %s628_s22 = smov [#allocation10]  }
  0x35   :  { %s42_s21 = sshll.u32 %s627_s19, 4  ;;  %s72_s23 = sshll.u32 %s628_s22, 4  ;;  %s43_s21 = int_to_ptr.vmem [resolvable:$true] %s42_s21  ;;  %s73_s23 = int_to_ptr.vmem [resolvable:$true] %s72_s23 }
  0x36   :  { %s548_s26 = scalar_lea.hbm %s780_s2, 256 }
  0x37   :  { %p549_p10 = scmp.ne.s32.totalorder %s780_s2, %s548_s26  ;;  %p552_p11 = scmp.lt.u32.totalorder %s548_s26, %s780_s2 }
  0x39   :  { %p554_p12 = pnand %p552_p11, %p549_p10 }
  0x3b   :  { %557 = shalt.err (!%p554_p12)
}
  0x3c   :  { %s558_s0 = scalar_lea.vmem %s43_s21, 256  ;;  %p563_p0 = scmp.lt.s32.totalorder %s43_s21, %s43_s21 }
  0x3d   :  { %p559_p13 = scmp.ne.s32.totalorder %s43_s21, %s558_s0  ;;  %p564_p1 = scmp.lt.s32.totalorder %s558_s0, %s558_s0 }
  0x3f   :  { %p565_p2 = por %p564_p1, %p563_p0 }
  0x41   :  { %p566_p3 = pnand %p565_p2, %p559_p13 }
  0x43   :  { %569 = shalt.err (!%p566_p3)
}
  0x44   :  { %48 = dma.hbm_to_vmem [thread:$0]  %s780_s2, 256, %s43_s21, [#allocation6], %s625_s28, %s625_s28, %s626_s29  }
  0x45   :  { %s570_s13 = scalar_lea.hbm %s785_s7, 256 }
  0x46   :  { %p571_p4 = scmp.ne.s32.totalorder %s785_s7, %s570_s13  ;;  %p574_p5 = scmp.lt.u32.totalorder %s570_s13, %s785_s7 }
  0x48   :  { %p576_p6 = pnand %p574_p5, %p571_p4 }
  0x4a   :  { %579 = shalt.err (!%p576_p6)
}
  0x4b   :  { %s580_s4 = scalar_lea.vmem %s73_s23, 256  ;;  %p585_p8 = scmp.lt.s32.totalorder %s73_s23, %s73_s23 }
  0x4c   :  { %p581_p7 = scmp.ne.s32.totalorder %s73_s23, %s580_s4  ;;  %p586_p9 = scmp.lt.s32.totalorder %s580_s4, %s580_s4 }
  0x4e   :  { %p587_p10 = por %p586_p9, %p585_p8 }
  0x50   :  { %p588_p11 = pnand %p587_p10, %p581_p7 }
  0x52   :  { %591 = shalt.err (!%p588_p11)
}
  0x53   :  { %78 = dma.hbm_to_vmem [thread:$0]  %s785_s7, 256, %s73_s23, [#allocation9], %s625_s28, %s625_s28, %s626_s29  }
  0x54   :  { %614 = dma.done.wait [#allocation3], 128  }
  0x55   :  { %615 = vsyncadd [#allocation3], 4294967168 }
  0x56   :  { %616 = dma.done.wait [#allocation6], 384  }
  0x57   :  { %617 = vsyncadd [#allocation6], 4294966912 }
  0x58   :  { %618 = dma.done.wait [#allocation9], 384  }
  0x59   :  { %619 = vsyncadd [#allocation9], 4294966912  ;;  %v629_v0 = vmov 0.0   ;;  %vm630_vm0 = vmmov 0   ;;  %v475_v1 = vld [vmem:[#allocation7] sm:$0xff]   ;;  %v476_v2 = vld [vmem:[#allocation8] sm:$0xff]  }
  0x5a   :  { %437 = vmatprep.subr.bf16.mxu0 %v629_v0  ;;  %445 = vmatprep.subr.bf16.mxu1 %v629_v0  ;;  %v477_v3 = vld [vmem:[#allocation7 + $0x8] sm:$0xff]   ;;  %v165_v4 = vld [vmem:[#allocation5] sm:$0xff]  ;;  %vm182_vm1 = vcmask 130048   ;;  %v95_v5 = vld [vmem:[#allocation2] sm:$0xff]  ;;  %vm120_vm2 = vcmask 261120   ;;  %vm242_vm3 = vcmask 531456  }
  0x5b   :  { %447 = vmatprep.mubr.msk.bf16.mxu1 %vm630_vm0, %v629_v0  ;;  %441 = vmatprep.mubr.msk.bf16.mxu0 %vm630_vm0, %v629_v0  ;;  %v166_v6 = vpack.c.bf16 %v165_v4, %v165_v4  ;;  %v96_v7 = vpack.c.bf16 %v95_v5, %v95_v5  ;;  %v478_v8 = vld [vmem:[#allocation10] sm:$0xff]   ;;  %v480_v9 = vld [vmem:[%s784_s6] sm:$0xff]   ;;  %v481_v29 = vld [vmem:[%s784_s6 + $0x8] sm:$0xff]   ;;  %vm378_vm4 = vcmask 64512   ;;  %s631_s6 = smov [#allocation11]   ;;  %vm392_vm5 = vcmask 57344  }
  0x5c   :  { %438 = vmatpush3.bf16.msra.mxu0 %v475_v1  ;;  %446 = vmatpush3.bf16.msra.mxu1 %v476_v2  ;;  %v415_v10 = vld [vmem:[%s783_s5] ss:$0 sm:$0xff]  ;;  %s400_s23 = sshll.u32 %s631_s6, 4  ;;  %s401_s23 = int_to_ptr.vmem [resolvable:$true] %s400_s23 }
  0x5d   :  { %439 = vmatprep.subr.bf16.mxu0 %v629_v0  ;;  %v411_v14 = vld [vmem:[%s781_s3] ss:$0 sm:$0xff]  ;;  %s592_s24 = scalar_lea.vmem %s401_s23, 16  ;;  %s596_s25 = scalar_lea.vmem %s401_s23, 32 }
  0x5e   :  { %v479_v28 = vld [vmem:[#allocation10 + $0x8] sm:$0xff]   ;;  %p593_p12 = scmp.ne.s32.totalorder %s401_s23, %s592_s24  ;;  %p597_p13 = scmp.lt.s32.totalorder %s401_s23, %s401_s23 }
  0x5f   :  { %448 = vmatmul.mubr.msk.bf16.vlgmr.msra.gmra.mrb[0].mxu1 %vm182_vm1, %v166_v6  ;;  %p598_p0 = scmp.lt.s32.totalorder %s596_s25, %s592_s24 }
  0x60   :  { %440 = vmatpush3.bf16.msra.mxu0 %v477_v3  ;;  %453 = vmatprep.mubr.msk.bf16.mxu1 %vm242_vm3, %v480_v9 }
  0x61   :  { %p599_p1 = por %p598_p0, %p597_p13 }
  0x63   :  { %442 = vmatmul.mubr.msk.bf16.vlgmr.msra.gmra.mrb[0].mxu0 %vm120_vm2, %v96_v7  ;;  %p600_p2 = pnand %p599_p1, %p593_p12 }
  0x64   :  { %459 = vmatprep.mubr.msk.bf16.mxu0 %vm242_vm3, %v478_v8 }
 0x132   :  { %v220_v11 = vpop.f32.mrb[0].mxu1 }
 0x133   :  { %v221_v12 = vadd.f32 %v415_v10, %v220_v11  ;;  %v449_v13 = vpop.f32.mrb[1].mxu1 }
 0x134   :  { %v223_v15 = vpop.f32.mrb[2].mxu1 }
 0x135   :  { %v226_v16 = vmax.f32 %v221_v12, 0.0  ;;  %v450_v18 = vpop.f32.mrb[3].mxu1 }
 0x136   :  { %v158_v17 = vpop.f32.mrb[0].mxu0 }
 0x137   :  { %v159_v19 = vadd.f32 %v411_v14, %v158_v17  ;;  %v443_v20 = vpop.f32.mrb[1].mxu0  ;;  %v305_v21 = vpack.c.bf16 %v226_v16, %v226_v16 }
 0x138   :  { %v161_v22 = vpop.f32.mrb[2].mxu0 }
 0x139   :  { %v164_v23 = vmax.f32 %v159_v19, 0.0  ;;  %v444_v24 = vpop.f32.mrb[3].mxu0  ;;  %464 = vmatprep.subr.msk.bf16.mxu0 %vm242_vm3, %v305_v21  ;;  %v323_v25 = vsel %vm242_vm3, %v305_v21, 0 }
 0x13a   :  { %458 = vmatpush3.bf16.xpose.msra.mxu0 %v323_v25 }
 0x13b   :  { %v231_v26 = vpack.c.bf16 %v164_v23, %v164_v23 }
 0x13d   :  { %463 = vmatprep.subr.msk.bf16.mxu1 %vm242_vm3, %v231_v26  ;;  %v250_v27 = vsel %vm242_vm3, %v231_v26, 0 }
 0x13e   :  { %452 = vmatpush3.bf16.xpose.msra.mxu1 %v250_v27 }
 0x141   :  { %460 = vmatmul.mubr.msk.bf16.vlgmr.msra.gmra.mrb[4].mxu0 %vm242_vm3, %v479_v28 }
 0x145   :  { %454 = vmatmul.mubr.msk.bf16.vlgmr.msra.gmra.mrb[4].mxu1 %vm242_vm3, %v481_v29 }
 0x214   :  { %v461_v30 = vpop.f32.mrb[4].mxu0 }
 0x215   :  { %v359_v31 = vpop.f32.mrb[5].mxu0 }
 0x216   :  { %v462_v32 = vpop.f32.mrb[6].mxu0 }
 0x217   :  { %v362_v34 = vpop.f32.mrb[7].mxu0 }
 0x218   :  { %v455_v33 = vpop.f32.mrb[4].mxu1 }
 0x219   :  { %v376_v35 = vmul.f32 %v461_v30, %v455_v33  ;;  %v286_v36 = vpop.f32.mrb[5].mxu1 }
 0x21a   :  { %v374_v37 = vmul.f32 %v359_v31, %v286_v36  ;;  %v456_v38 = vpop.f32.mrb[6].mxu1 }
 0x21b   :  { %v377_v39 = vmul.f32 %v462_v32, %v456_v38  ;;  %v289_v40 = vpop.f32.mrb[7].mxu1  ;;  %v382_v45 = vsel %vm378_vm4, %v376_v35, 0.0 }
 0x21c   :  { %v375_v41 = vmul.f32 %v362_v34, %v289_v40  ;;  %v379_v42 = vsel %vm378_vm4, %v374_v37, 0.0 }
 0x21d   :  { %v384_v47 = vsel %vm378_vm4, %v377_v39, 0.0 }
 0x21e   :  { %v380_v43 = vsel %vm378_vm4, %v375_v41, 0.0 }
 0x21f   :  { %v381_v44 = vadd.f32 %v380_v43, %v379_v42 }
 0x221   :  { %v383_v46 = vadd.f32 %v382_v45, %v381_v44 }
 0x223   :  { %v385_v48 = vadd.f32 %v384_v47, %v383_v46 }
 0x225   :  { %v386_v49 = vrot.slane %v385_v48, 4 }
 0x227   :  { %v387_v50 = vadd.f32 %v386_v49, %v385_v48 }
 0x229   :  { %v388_v51 = vrot.slane %v387_v50, 2 }
 0x22b   :  { %v389_v52 = vadd.f32 %v388_v51, %v387_v50 }
 0x22d   :  { %v390_v53 = vrot.slane %v389_v52, 1 }
 0x22f   :  { %v391_v54 = vadd.f32 %v390_v53, %v389_v52 }
 0x231   :  { %393 = vst.msk [vmem:[#allocation11] sm:$0x1] %vm392_vm5, %v391_v54 }
 0x232   :  { %603 = shalt.err (!%p600_p2)
}
 0x233   :  { %s604_s1 = scalar_lea.hbm %s786_s8, 16 }
 0x234   :  { %p605_p3 = scmp.ne.s32.totalorder %s786_s8, %s604_s1  ;;  %p608_p4 = scmp.lt.u32.totalorder %s604_s1, %s786_s8 }
 0x236   :  { %p610_p5 = pnand %p608_p4, %p605_p3 }
 0x238   :  { %613 = shalt.err (!%p610_p5)
}
 0x239   :  { %403 = dma.vmem_to_hbm [thread:$0]  %s401_s23, 16, %s786_s8, [#allocation4]  }
 0x23a   :  { %620 = dma.done.wait [#allocation4], 16  }
 0x23b   :  { %621 = vsyncadd [#allocation4], 4294967280 }
 0x23c   :  { %407 = vsyncpa [#allocation3], 1 }
 0x23d   :  { %408 = vsyncpa [#allocation6], 1 }
 0x23e   :  { %409 = vsyncpa [#allocation9], 1 }
 0x23f   :  { %410 = vsyncpa [#allocation4], 1 }

</bundles_post_ra>
